<compile_context>
chip_gen: v7x
topology: tpu7x:2x2x1
jax: 0.10.0
libtpu: 0.0.40
codegen_flags: <defaults>
</compile_context>

<pallas_src>
import functools

import jax
import jax.numpy as jnp
from jax.experimental import pallas as pl
from jax.experimental.pallas import tpu as pltpu


def _round_up(x: int, m: int) -> int:
    return (x + m - 1) // m * m


def _head_kernel(x_ref, w1_ref, b1_ref, w2_ref, b2_ref, o_ref):
    # dense: [TILE_M, D] @ [D, H] -> f32 accumulate, f32 bias, tanh on EUP
    h = jnp.dot(x_ref[...], w1_ref[...], preferred_element_type=jnp.float32)
    h = jnp.tanh(h + b1_ref[...])
    # out_proj: [TILE_M, H] @ [H, C_pad] -> f32 accumulate, f32 bias
    out = jnp.dot(h.astype(w2_ref.dtype), w2_ref[...],
                  preferred_element_type=jnp.float32)
    out = out + b2_ref[...]
    o_ref[...] = out.astype(o_ref.dtype)


@functools.partial(jax.jit, static_argnames=("tile_m", "compute_dtype"))
def bart_classification_head(hidden_states, w_dense, b_dense, w_out, b_out,
                             *, tile_m: int = 512, compute_dtype=None):
    """hidden_states: [B, S, D] -> logits: [B, S, C]

    w_dense: [D, H], b_dense: [H], w_out: [H, C], b_out: [C]
    compute_dtype: dtype fed to the MXU (e.g. jnp.bfloat16); accumulation and
                   bias-add stay in f32. Defaults to hidden_states.dtype.
    """
    B, S, D = hidden_states.shape
    H = w_dense.shape[1]
    C = w_out.shape[1]
    M = B * S
    out_dtype = hidden_states.dtype
    if compute_dtype is None:
        compute_dtype = hidden_states.dtype
    compute_dtype = jnp.dtype(compute_dtype)

    # ---- padding for TPU-friendly layout -----------------------------------
    # Rows: multiple of the M tile (tile itself a multiple of 8 sublanes).
    tile_m = min(tile_m, _round_up(M, 8))
    m_pad = _round_up(M, tile_m)
    # Classes: multiple of 128 lanes -> unmasked vst + dense MXU columns.
    c_pad = _round_up(C, 128)

    x2d = hidden_states.reshape(M, D).astype(compute_dtype)
    if m_pad != M:
        x2d = jnp.pad(x2d, ((0, m_pad - M), (0, 0)))

    w1 = w_dense.astype(compute_dtype)                       # [D, H]
    b1 = b_dense.reshape(1, H).astype(jnp.float32)           # [1, H]
    w2 = w_out.astype(compute_dtype)                         # [H, C]
    b2 = b_out.reshape(1, C).astype(jnp.float32)             # [1, C]
    if c_pad != C:
        w2 = jnp.pad(w2, ((0, 0), (0, c_pad - C)))
        b2 = jnp.pad(b2, ((0, 0), (0, c_pad - C)))

    grid = (m_pad // tile_m,)

    # ---- VMEM budget: double-buffered x/out + weights + f32 intermediates ---
    in_isz = compute_dtype.itemsize
    out_isz = jnp.dtype(out_dtype).itemsize
    vmem_est = (
        2 * tile_m * D * in_isz            # x double buffer
        + 2 * tile_m * c_pad * out_isz     # out double buffer
        + 2 * (D * H + H * c_pad) * in_isz # weights (conservatively x2)
        + 2 * (H + c_pad) * 4 * 2          # biases (f32)
        + tile_m * (H + c_pad) * 4         # in-register/VMEM f32 intermediates
    )
    vmem_limit = min(max(2 * vmem_est, 32 << 20), 64 << 20)

    cost = pl.CostEstimate(
        flops=2 * m_pad * D * H + 2 * m_pad * H * c_pad,
        transcendentals=m_pad * H,
        bytes_accessed=(m_pad * D * in_isz + D * H * in_isz
                        + H * c_pad * in_isz + m_pad * c_pad * out_isz),
    )

    out2d = pl.pallas_call(
        _head_kernel,
        out_shape=jax.ShapeDtypeStruct((m_pad, c_pad), out_dtype),
        grid=grid,
        in_specs=[
            pl.BlockSpec((tile_m, D), lambda i: (i, 0)),   # x tile
            pl.BlockSpec((D, H), lambda i: (0, 0)),        # W1 (resident)
            pl.BlockSpec((1, H), lambda i: (0, 0)),        # b1
            pl.BlockSpec((H, c_pad), lambda i: (0, 0)),    # W2 (resident)
            pl.BlockSpec((1, c_pad), lambda i: (0, 0)),    # b2
        ],
        out_specs=pl.BlockSpec((tile_m, c_pad), lambda i: (i, 0)),
        compiler_params=pltpu.CompilerParams(
            dimension_semantics=("parallel",),
            vmem_limit_bytes=int(vmem_limit),
        ),
        cost_estimate=cost,
    )(x2d, w1, b1, w2, b2)

    return out2d[:M, :C].reshape(B, S, C)


if __name__ == "__main__":
    # Small shapes consistent with the module's forward:
    #   input_dim = 32, inner_dim = 32, num_classes = 8
    #   hidden_states: [batch=2, seq=8, input_dim=32]
    # TODO(synk): nn.Dropout is modeled as identity (eval mode / p=0.0).
    B, S, D, H, C = 2, 8, 32, 32, 8

    key = jax.random.PRNGKey(0)
    kx, kw1, kb1, kw2, kb2 = jax.random.split(key, 5)

    hidden_states = jax.random.normal(kx, (B, S, D), dtype=jnp.float32)

    # Deterministic parameter init (shapes from nn.Linear layers), stored [in, out].
    w_dense = jax.random.normal(kw1, (D, H), dtype=jnp.float32) * (1.0 / jnp.sqrt(D))
    b_dense = jax.random.normal(kb1, (H,), dtype=jnp.float32) * 0.01
    w_out = jax.random.normal(kw2, (H, C), dtype=jnp.float32) * (1.0 / jnp.sqrt(H))
    b_out = jax.random.normal(kb2, (C,), dtype=jnp.float32) * 0.01

    # Pure-JAX reference.
    ref = jnp.tanh(hidden_states.reshape(-1, D) @ w_dense + b_dense) @ w_out + b_out
    ref = ref.reshape(B, S, C)

    # f32 path (tight check).
    logits = bart_classification_head(hidden_states, w_dense, b_dense, w_out, b_out)
    logits = jax.block_until_ready(logits)
    assert logits.shape == (B, S, C)
    assert jnp.allclose(logits, ref, atol=1e-5, rtol=1e-5)

    # bf16 operand path (MXU-friendly; f32 accumulation), loose check.
    logits_bf16 = bart_classification_head(
        hidden_states, w_dense, b_dense, w_out, b_out, compute_dtype=jnp.bfloat16)
    logits_bf16 = jax.block_until_ready(logits_bf16)
    assert logits_bf16.shape == (B, S, C)
    assert jnp.allclose(logits_bf16, ref, atol=5e-2, rtol=5e-2)

    print("KERNEL_OK")
</pallas_src>

<mosaic_0001>
module attributes {stable_mosaic.version = 11 : i64} {
  func.func @_head_kernel(%arg0: i32, %arg1: memref<16x32xf32, #tpu.memory_space<vmem>>, %arg2: memref<32x32xf32, #tpu.memory_space<vmem>>, %arg3: memref<1x32xf32, #tpu.memory_space<vmem>>, %arg4: memref<32x128xf32, #tpu.memory_space<vmem>>, %arg5: memref<1x128xf32, #tpu.memory_space<vmem>>, %arg6: memref<16x128xf32, #tpu.memory_space<vmem>>) attributes {dimension_semantics = [#tpu.dimension_semantics<parallel>], iteration_bounds = array<i64: 1>, scalar_prefetch = 0 : i64, scratch_operands = 0 : i64, tpu.core_type = #tpu.core_type<tc>, window_params = [{transform_indices = @transform_0, window_bounds = array<i64: 16, 32>}, {pipeline_mode = #tpu.pipeline_mode<synchronous>, transform_indices = @transform_1, window_bounds = array<i64: 32, 32>}, {pipeline_mode = #tpu.pipeline_mode<synchronous>, transform_indices = @transform_2, window_bounds = array<i64: 1, 32>}, {pipeline_mode = #tpu.pipeline_mode<synchronous>, transform_indices = @transform_3, window_bounds = array<i64: 32, 128>}, {pipeline_mode = #tpu.pipeline_mode<synchronous>, transform_indices = @transform_4, window_bounds = array<i64: 1, 128>}, {transform_indices = @transform_5, window_bounds = array<i64: 16, 128>}]} {
    %c0 = arith.constant 0 : index
    %c0_0 = arith.constant 0 : index
    %0 = vector.load %arg1[%c0, %c0_0] : memref<16x32xf32, #tpu.memory_space<vmem>>, vector<16x32xf32>
    %c0_1 = arith.constant 0 : index
    %c0_2 = arith.constant 0 : index
    %1 = vector.load %arg2[%c0_1, %c0_2] : memref<32x32xf32, #tpu.memory_space<vmem>>, vector<32x32xf32>
    %cst = arith.constant dense<0.000000e+00> : vector<16x32xf32>
    %2 = tpu.matmul %0, %1, %cst {dimension_numbers = #tpu.dot_dimension_numbers<[1], [0], [0], [1], [0, 0, 1, 1], [], []>} : vector<16x32xf32>, vector<32x32xf32>, vector<16x32xf32> -> vector<16x32xf32>
    %c0_3 = arith.constant 0 : index
    %c0_4 = arith.constant 0 : index
    %3 = vector.load %arg3[%c0_3, %c0_4] : memref<1x32xf32, #tpu.memory_space<vmem>>, vector<1x32xf32>
    %4 = vector.broadcast %3 : vector<1x32xf32> to vector<16x32xf32>
    %5 = arith.addf %2, %4 : vector<16x32xf32>
    %6 = math.tanh %5 : vector<16x32xf32>
    %c0_5 = arith.constant 0 : index
    %c0_6 = arith.constant 0 : index
    %7 = vector.load %arg4[%c0_5, %c0_6] : memref<32x128xf32, #tpu.memory_space<vmem>>, vector<32x128xf32>
    %cst_7 = arith.constant dense<0.000000e+00> : vector<16x128xf32>
    %8 = tpu.matmul %6, %7, %cst_7 {dimension_numbers = #tpu.dot_dimension_numbers<[1], [0], [0], [1], [0, 0, 1, 1], [], []>} : vector<16x32xf32>, vector<32x128xf32>, vector<16x128xf32> -> vector<16x128xf32>
    %c0_8 = arith.constant 0 : index
    %c0_9 = arith.constant 0 : index
    %9 = vector.load %arg5[%c0_8, %c0_9] : memref<1x128xf32, #tpu.memory_space<vmem>>, vector<1x128xf32>
    %10 = vector.broadcast %9 : vector<1x128xf32> to vector<16x128xf32>
    %11 = arith.addf %8, %10 : vector<16x128xf32>
    %c0_10 = arith.constant 0 : index
    %c0_11 = arith.constant 0 : index
    %12 = vector.load %arg6[%c0_10, %c0_11] : memref<16x128xf32, #tpu.memory_space<vmem>>, vector<16x128xf32>
    tpu.vector_store %arg6[%c0_10, %c0_11], %11 {strides = array<i32>} : memref<16x128xf32, #tpu.memory_space<vmem>>, vector<16x128xf32>,
    return
  }
  func.func @transform_0(%arg0: i32) -> (i32, i32) {
    %c0_i32 = arith.constant 0 : i32
    %c0_i32_0 = arith.constant 0 : i32
    return %arg0, %c0_i32 : i32, i32
  }
  func.func @transform_1(%arg0: i32) -> (i32, i32) {
    %c0_i32 = arith.constant 0 : i32
    %c0_i32_0 = arith.constant 0 : i32
    %c0_i32_1 = arith.constant 0 : i32
    return %c0_i32, %c0_i32_0 : i32, i32
  }
  func.func @transform_2(%arg0: i32) -> (i32, i32) {
    %c0_i32 = arith.constant 0 : i32
    %c0_i32_0 = arith.constant 0 : i32
    %c0_i32_1 = arith.constant 0 : i32
    return %c0_i32, %c0_i32_0 : i32, i32
  }
  func.func @transform_3(%arg0: i32) -> (i32, i32) {
    %c0_i32 = arith.constant 0 : i32
    %c0_i32_0 = arith.constant 0 : i32
    %c0_i32_1 = arith.constant 0 : i32
    return %c0_i32, %c0_i32_0 : i32, i32
  }
  func.func @transform_4(%arg0: i32) -> (i32, i32) {
    %c0_i32 = arith.constant 0 : i32
    %c0_i32_0 = arith.constant 0 : i32
    %c0_i32_1 = arith.constant 0 : i32
    return %c0_i32, %c0_i32_0 : i32, i32
  }
  func.func @transform_5(%arg0: i32) -> (i32, i32) {
    %c0_i32 = arith.constant 0 : i32
    %c0_i32_0 = arith.constant 0 : i32
    return %arg0, %c0_i32 : i32, i32
  }
}

</mosaic_0001>

<bundles_post_ra>
// kernel: bart_classification_head.1
= control target key start
LH: loop header
LB: loop body
LE: loop exit
PB: predicated region body
PF: predicated region fallthrough
CT: control target
= control target key end

     0   :  { %vm33_vm0 = vcmask 261120   ;;  %s351_s1 = inlined_call_operand.vmem [shape: f32[32,32], index: 1, kind: input, shape index: {}]   ;;  %s352_s0 = inlined_call_operand.vmem [shape: f32[16,32], index: 0, kind: input, shape index: {}]   ;;  %s353_s3 = inlined_call_operand.vmem [shape: f32[32,128], index: 3, kind: input, shape index: {}]   ;;  %s354_s2 = inlined_call_operand.vmem [shape: f32[1,32], index: 2, kind: input, shape index: {}]   ;;  %s355_s4 = inlined_call_operand.vmem [shape: f32[1,128], index: 4, kind: input, shape index: {}]   ;;  %s356_s5 = inlined_call_operand.vmem [shape: f32[16,128], index: 5, kind: output, shape index: {}]  }
   0x1   :  { %v22_v0 = vld [vmem:[%s351_s1] sm:$0xff]  ;;  %v23_v1 = vld [vmem:[%s351_s1 + $0x8] sm:$0xff]  ;;  %v24_v2 = vld [vmem:[%s351_s1 + $0x10] sm:$0xff] }
   0x2   :  { %v255_v3 = vpack.c.bf16 %v23_v1, %v22_v0  ;;  %v25_v4 = vld [vmem:[%s351_s1 + $0x18] sm:$0xff]  ;;  %v20_v5 = vld [vmem:[%s352_s0] sm:$0xff]  ;;  %v21_v7 = vld [vmem:[%s352_s0 + $0x8] sm:$0xff] }
   0x3   :  { %v259_v6 = vpack.c.bf16 %v25_v4, %v24_v2  ;;  %241 = vmatprep.mubr.msk.f32.mxu0 %vm33_vm0, %v20_v5  ;;  %v117_v8 = vld [vmem:[%s353_s3] sm:$0xff]  ;;  %v118_v9 = vld [vmem:[%s353_s3 + $0x8] sm:$0xff]  ;;  %v119_v10 = vld [vmem:[%s353_s3 + $0x10] sm:$0xff] }
   0x4   :  { %256 = vmatprep.subr.bf16.mxu0 %v255_v3  ;;  %v263_v11 = vpack.c.bf16 %v118_v9, %v117_v8  ;;  %v120_v12 = vld [vmem:[%s353_s3 + $0x18] sm:$0xff]  ;;  %v215_v14 = vld [vmem:[%s354_s2] ss:$0 sm:$0xff] }
   0x5   :  { %258 = vmatpush3.bf16.msra.mxu0 %v255_v3  ;;  %v267_v13 = vpack.c.bf16 %v120_v12, %v119_v10  ;;  %v218_v21 = vld [vmem:[%s355_s4] ss:$0 sm:$0xff] }
   0x6   :  { %260 = vmatprep.subr.bf16.mxu0 %v259_v6  ;;  %264 = vmatprep.subr.bf16.mxu1 %v263_v11 }
   0x7   :  { %266 = vmatpush3.bf16.msra.mxu1 %v263_v11 }
   0x8   :  { %268 = vmatprep.subr.bf16.mxu1 %v267_v13 }
   0x9   :  { %262 = vmatpush3.bf16.msra.mxu0 %v259_v6 }
   0xb   :  { %270 = vmatpush3.bf16.msra.mxu1 %v267_v13 }
   0xc   :  { %242 = vmatmul.mubr.msk.f32.vlgmr.msra.gmra.mrb[0].mxu0 %vm33_vm0, %v21_v7 }
  0xdf   :  { %v243_v15 = vpop.f32.mrb[0].mxu0 }
  0xe0   :  { %v112_v16 = vadd.f32 %v243_v15, %v215_v14  ;;  %v106_v17 = vpop.f32.mrb[1].mxu0 }
  0xe1   :  { %v107_v18 = vadd.f32 %v215_v14, %v106_v17 }
  0xe3   :  { %271 = vtanh.f32 %v107_v18 }
  0xe4   :  { %273 = vtanh.f32 %v112_v16 }
  0xed   :  { %v272_v19 = vpop.eup %271 }
  0xee   :  { %v274_v20 = vpop.eup %273  ;;  %252 = vmatprep.mubr.msk.f32.mxu1 %vm33_vm0, %v272_v19 }
  0xef   :  { %253 = vmatmul.mubr.msk.f32.vlgmr.msra.gmra.mrb[0].mxu1 %vm33_vm0, %v274_v20 }
 0x1c2   :  { %v254_v22 = vpop.f32.mrb[0].mxu1 }
 0x1c3   :  { %v206_v23 = vadd.f32 %v254_v22, %v218_v21  ;;  %v200_v24 = vpop.f32.mrb[1].mxu1 }
 0x1c4   :  { %v201_v25 = vadd.f32 %v218_v21, %v200_v24 }
 0x1c5   :  { %210 = vst [vmem:[%s356_s5 + $0x8] sm:$0xff] %v206_v23 }
 0x1c6   :  { %209 = vst [vmem:[%s356_s5] sm:$0xff] %v201_v25 }

</bundles_post_ra>
